<compile_context>
chip_gen: v5e
topology: v5e:2x2
jax: 0.10.0
libtpu: 0.0.40
codegen_flags: <defaults>
</compile_context>

<pallas_src>
import functools

import jax
import jax.numpy as jnp
from jax.experimental import pallas as pl
from jax.experimental.pallas import tpu as pltpu


def _round_up(n, m):
    return ((n + m - 1) // m) * m


def _actor_critic_kernel(x_ref, w1_ref, b1_ref, wpv_ref, bpv_ref, out_ref, *,
                         apply_softmax: bool, num_actions: int, compute_dtype):
    # feature_net: ReLU(x @ W1 + b1).  x arrives as the caller's un-padded
    # f32 tile; cast to the matmul compute dtype in-kernel (hidden behind the
    # pipeline instead of being a separate XLA pass over the activations).
    x = x_ref[...].astype(compute_dtype)
    feat = jnp.dot(x, w1_ref[...], preferred_element_type=jnp.float32)
    feat = jnp.maximum(feat + b1_ref[...], 0.0)

    # Fused heads: [pg | v | zero-pad] -> one lane-dense [TB, NP] matmul.
    pgv = jnp.dot(feat.astype(compute_dtype), wpv_ref[...],
                  preferred_element_type=jnp.float32)
    pgv = pgv + bpv_ref[...]

    if apply_softmax:
        # Softmax over the action columns only; mask out value + pad columns.
        col = jax.lax.broadcasted_iota(jnp.int32, pgv.shape, 1)
        is_action = col < num_actions
        logits = jnp.where(is_action, pgv, -jnp.inf)
        m = jnp.max(logits, axis=1, keepdims=True)
        e = jnp.exp(logits - m)                  # exp(-inf) == 0 on masked cols
        s = jnp.sum(e, axis=1, keepdims=True)
        probs = e / s                            # exact: (TB,1) divide is ~free
        pgv = jnp.where(is_action, probs, pgv)   # keep raw v in its column

    out_ref[...] = pgv.astype(out_ref.dtype)


def prepare_packed_params(params, compute_dtype=jnp.bfloat16):
    """One-time weight packing: zero-pad to lane-dense shapes + cast.

    Hoisted off the per-step path so XLA does not re-materialize the pad/cast
    of every weight on every forward call.
    """
    I, F = params["w1"].shape
    A = params["wp"].shape[1]
    # Shared K/N dim of the two matmuls.  Round to 256 once F > 128 so the
    # 256-wide MXUs on v6e/v7x see full-width operands (128 matches v5e).
    Fpad = _round_up(F, 256) if F > 128 else _round_up(F, 128)
    NP = _round_up(A + 1, 128)                 # fused [policy | value] width

    w1 = jnp.zeros((I, Fpad), compute_dtype).at[:, :F].set(
        params["w1"].astype(compute_dtype))
    b1 = jnp.zeros((1, Fpad), jnp.float32).at[:, :F].set(params["b1"])
    wpv = jnp.zeros((Fpad, NP), compute_dtype)
    wpv = wpv.at[:F, :A].set(params["wp"].astype(compute_dtype))
    wpv = wpv.at[:F, A:A + 1].set(params["wv"].astype(compute_dtype))
    bpv = jnp.zeros((1, NP), jnp.float32)
    bpv = bpv.at[:, :A].set(params["bp"])
    bpv = bpv.at[:, A:A + 1].set(params["bv"])
    return {"w1": w1, "b1": b1, "wpv": wpv, "bpv": bpv,
            "inputlen": I, "featurelen": F, "action_space": A,
            "compute_dtype": jnp.dtype(compute_dtype)}


def actor_critic_forward(x, packed, apply_softmax=False, *,
                         block_b=512, out_dtype=None):
    """ActorCriticNet forward as one Pallas kernel.

    x: [B, inputlen] float32 (read un-padded by the kernel)
    packed: output of prepare_packed_params()
    Returns (pg, v) with shapes ([B, A], [B, 1]) in `out_dtype`
    (defaults to the matmul compute dtype).
    """
    B, I = x.shape
    assert I == packed["inputlen"], "input width mismatch"
    A = packed["action_space"]
    compute_dtype = packed["compute_dtype"]
    Fpad = packed["w1"].shape[1]
    NP = packed["wpv"].shape[1]
    out_dtype = jnp.dtype(out_dtype) if out_dtype is not None else compute_dtype

    cbytes = compute_dtype.itemsize
    obytes = out_dtype.itemsize

    # Batch tile: multiple of 16 when any bf16 vregs are involved (full
    # sublane packing), >=2 grid steps when the batch allows it (so v7x's
    # second TensorCore is used), sized from cdiv so Bp-B padding < one tile.
    # On v5e/v6e (128 MiB VMEM) block_b can be swept up to 1024-2048.
    sub = 16 if (cbytes == 2 or obytes == 2) else 8
    ntiles = pl.cdiv(B, block_b)
    if B >= 2 * sub:
        ntiles = max(ntiles, 2)
    TB = _round_up(pl.cdiv(B, ntiles), sub)
    Bp = _round_up(B, TB)

    # Only row-pad x when the batch does not tile evenly (no column pad, no
    # dtype cast: the activation read stays ~B*I*4 bytes).
    x_in = x if Bp == B else jnp.zeros((Bp, I), x.dtype).at[:B, :].set(x)

    kernel = functools.partial(_actor_critic_kernel,
                               apply_softmax=apply_softmax, num_actions=A,
                               compute_dtype=compute_dtype)

    weight_bytes = (I * Fpad + Fpad * NP) * cbytes + (Fpad + NP) * 4
    tile_bytes = TB * I * 4 + TB * NP * obytes
    # Default pipeline double-buffers every block; add headroom for internal
    # scratch and cap so the same kernel stays inside v7x's 64 MiB VMEM.
    vmem_limit = min(int(2 * (weight_bytes + tile_bytes) * 1.5) + (4 << 20),
                     64 << 20)

    flops = 2 * Bp * (I * Fpad + Fpad * NP)
    bytes_accessed = Bp * I * 4 + weight_bytes + Bp * NP * obytes
    transcendentals = Bp * NP if apply_softmax else 0

    out = pl.pallas_call(
        kernel,
        out_shape=jax.ShapeDtypeStruct((Bp, NP), out_dtype),
        grid_spec=pltpu.PrefetchScalarGridSpec(
            num_scalar_prefetch=0,
            grid=(Bp // TB,),
            in_specs=[
                pl.BlockSpec((TB, I), lambda i: (i, 0)),     # x tile, un-padded f32
                pl.BlockSpec((I, Fpad), lambda i: (0, 0)),   # w1 (VMEM-resident)
                pl.BlockSpec((1, Fpad), lambda i: (0, 0)),   # b1
                pl.BlockSpec((Fpad, NP), lambda i: (0, 0)),  # fused heads weight
                pl.BlockSpec((1, NP), lambda i: (0, 0)),     # fused heads bias
            ],
            out_specs=pl.BlockSpec((TB, NP), lambda i: (i, 0)),
        ),
        compiler_params=pltpu.CompilerParams(
            dimension_semantics=("parallel",),   # 2 TCs on v7x when grid >= 2
            vmem_limit_bytes=vmem_limit,
        ),
        cost_estimate=pl.CostEstimate(
            flops=flops,
            transcendentals=transcendentals,
            bytes_accessed=bytes_accessed,
        ),
    )(x_in, packed["w1"], packed["b1"], packed["wpv"], packed["bpv"])

    # NOTE: a fused consumer could take `out` (the [Bp, NP] slab) directly and
    # skip these two slice copies.
    pg = out[:B, :A]
    v = out[:B, A:A + 1]
    return pg, v


def init_params(key, inputlen, featurelen, action_space):
    """Deterministic init mimicking nn.Linear's U(-1/sqrt(fan_in), 1/sqrt(fan_in))."""
    k1, k2, k3, k4, k5, k6 = jax.random.split(key, 6)

    def lin(kw, kb, fan_in, fan_out):
        bound = 1.0 / jnp.sqrt(fan_in)
        w = jax.random.uniform(kw, (fan_in, fan_out), jnp.float32, -bound, bound)
        b = jax.random.uniform(kb, (1, fan_out), jnp.float32, -bound, bound)
        return w, b

    w1, b1 = lin(k1, k2, inputlen, featurelen)      # feature_net (MLP) layer
    wp, bp = lin(k3, k4, featurelen, action_space)  # p_fc
    wv, bv = lin(k5, k6, featurelen, 1)             # v_fc
    return {"w1": w1, "b1": b1, "wp": wp, "bp": bp, "wv": wv, "bv": bv}


def _reference(x, p, apply_softmax):
    feat = jnp.maximum(x @ p["w1"] + p["b1"], 0.0)
    v = feat @ p["wv"] + p["bv"]
    pg = feat @ p["wp"] + p["bp"]
    if apply_softmax:
        pg = jax.nn.softmax(pg, axis=1)
    return pg, v


if __name__ == "__main__":
    # Small shapes consistent with the module: flat observation vector input.
    B, inputlen, featurelen, action_space = 8, 32, 32, 8

    key, kx, kp, kx2 = jax.random.split(jax.random.PRNGKey(0), 4)
    x = jax.random.normal(kx, (B, inputlen), jnp.float32)
    params = init_params(kp, inputlen, featurelen, action_space)

    ref_pg, ref_v = _reference(x, params, False)
    ref_pg_sm, _ = _reference(x, params, True)

    # f32 matmul path: tight checks (exact softmax normalization).
    packed_f32 = prepare_packed_params(params, compute_dtype=jnp.float32)
    pg, v = actor_critic_forward(x, packed_f32, apply_softmax=False)
    jax.block_until_ready((pg, v))
    pg_sm, v_sm = actor_critic_forward(x, packed_f32, apply_softmax=True)
    jax.block_until_ready((pg_sm, v_sm))
    assert jnp.allclose(pg, ref_pg, atol=1e-5), "f32 pg mismatch"
    assert jnp.allclose(v, ref_v, atol=1e-5), "f32 v mismatch"
    assert jnp.allclose(pg_sm, ref_pg_sm, atol=1e-4), "f32 softmax pg mismatch"
    assert jnp.allclose(jnp.sum(pg_sm, axis=1), 1.0, atol=1e-5)

    # Multi-tile grid (>= 2 steps, row-padded batch), still f32 weights.
    B2 = 40
    x2 = jax.random.normal(kx2, (B2, inputlen), jnp.float32)
    ref2_pg, ref2_v = _reference(x2, params, False)
    pg2, v2 = actor_critic_forward(x2, packed_f32, apply_softmax=False,
                                   block_b=16)
    jax.block_until_ready((pg2, v2))
    assert pg2.shape == (B2, action_space) and v2.shape == (B2, 1)
    assert jnp.allclose(pg2, ref2_pg, atol=1e-5), "multi-tile pg mismatch"
    assert jnp.allclose(v2, ref2_v, atol=1e-5), "multi-tile v mismatch"

    # bf16 matmul path (v6e/v7x fast path, bf16 output slab): loose tolerance.
    packed_bf16 = prepare_packed_params(params, compute_dtype=jnp.bfloat16)
    pg_b, v_b = actor_critic_forward(x, packed_bf16, apply_softmax=False)
    jax.block_until_ready((pg_b, v_b))
    pg_b_sm, _ = actor_critic_forward(x, packed_bf16, apply_softmax=True)
    jax.block_until_ready(pg_b_sm)
    assert jnp.allclose(pg_b.astype(jnp.float32), ref_pg,
                        atol=3e-2, rtol=3e-2), "bf16 pg mismatch"
    assert jnp.allclose(v_b.astype(jnp.float32), ref_v,
                        atol=3e-2, rtol=3e-2), "bf16 v mismatch"
    assert jnp.allclose(pg_b_sm.astype(jnp.float32), ref_pg_sm,
                        atol=3e-2), "bf16 softmax pg mismatch"
    assert jnp.allclose(jnp.sum(pg_b_sm.astype(jnp.float32), axis=1), 1.0,
                        atol=1e-2)

    # TODO(synk): FixedCategorical.sample() in get_action is a stochastic op
    # outside the forward pass; not implemented as a kernel.
    print("KERNEL_OK")
</pallas_src>

<mosaic_0001>
module attributes {stable_mosaic.version = 11 : i64} {
  func.func @_actor_critic_kernel(%arg0: i32, %arg1: memref<8x32xf32, #tpu.memory_space<vmem>>, %arg2: memref<32x128xf32, #tpu.memory_space<vmem>>, %arg3: memref<1x128xf32, #tpu.memory_space<vmem>>, %arg4: memref<128x128xf32, #tpu.memory_space<vmem>>, %arg5: memref<1x128xf32, #tpu.memory_space<vmem>>, %arg6: memref<8x128xf32, #tpu.memory_space<vmem>>) attributes {dimension_semantics = [#tpu.dimension_semantics<parallel>], iteration_bounds = array<i64: 1>, scalar_prefetch = 0 : i64, scratch_operands = 0 : i64, tpu.core_type = #tpu.core_type<tc>, window_params = [{transform_indices = @transform_0, window_bounds = array<i64: 8, 32>}, {pipeline_mode = #tpu.pipeline_mode<synchronous>, transform_indices = @transform_1, window_bounds = array<i64: 32, 128>}, {pipeline_mode = #tpu.pipeline_mode<synchronous>, transform_indices = @transform_2, window_bounds = array<i64: 1, 128>}, {pipeline_mode = #tpu.pipeline_mode<synchronous>, transform_indices = @transform_3, window_bounds = array<i64: 128, 128>}, {pipeline_mode = #tpu.pipeline_mode<synchronous>, transform_indices = @transform_4, window_bounds = array<i64: 1, 128>}, {transform_indices = @transform_5, window_bounds = array<i64: 8, 128>}]} {
    %c0 = arith.constant 0 : index
    %c0_0 = arith.constant 0 : index
    %0 = vector.load %arg1[%c0, %c0_0] : memref<8x32xf32, #tpu.memory_space<vmem>>, vector<8x32xf32>
    %c0_1 = arith.constant 0 : index
    %c0_2 = arith.constant 0 : index
    %1 = vector.load %arg2[%c0_1, %c0_2] : memref<32x128xf32, #tpu.memory_space<vmem>>, vector<32x128xf32>
    %cst = arith.constant dense<0.000000e+00> : vector<8x128xf32>
    %2 = tpu.matmul %0, %1, %cst {dimension_numbers = #tpu.dot_dimension_numbers<[1], [0], [0], [1], [0, 0, 1, 1], [], []>} : vector<8x32xf32>, vector<32x128xf32>, vector<8x128xf32> -> vector<8x128xf32>
    %c0_3 = arith.constant 0 : index
    %c0_4 = arith.constant 0 : index
    %3 = vector.load %arg3[%c0_3, %c0_4] : memref<1x128xf32, #tpu.memory_space<vmem>>, vector<1x128xf32>
    %4 = vector.broadcast %3 : vector<1x128xf32> to vector<8x128xf32>
    %5 = arith.addf %2, %4 : vector<8x128xf32>
    %cst_5 = arith.constant 0.000000e+00 : f32
    %6 = vector.broadcast %cst_5 : f32 to vector<8x128xf32>
    %7 = arith.maximumf %5, %6 : vector<8x128xf32>
    %c0_6 = arith.constant 0 : index
    %c0_7 = arith.constant 0 : index
    %8 = vector.load %arg4[%c0_6, %c0_7] : memref<128x128xf32, #tpu.memory_space<vmem>>, vector<128x128xf32>
    %cst_8 = arith.constant dense<0.000000e+00> : vector<8x128xf32>
    %9 = tpu.matmul %7, %8, %cst_8 {dimension_numbers = #tpu.dot_dimension_numbers<[1], [0], [0], [1], [0, 0, 1, 1], [], []>} : vector<8x128xf32>, vector<128x128xf32>, vector<8x128xf32> -> vector<8x128xf32>
    %c0_9 = arith.constant 0 : index
    %c0_10 = arith.constant 0 : index
    %10 = vector.load %arg5[%c0_9, %c0_10] : memref<1x128xf32, #tpu.memory_space<vmem>>, vector<1x128xf32>
    %11 = vector.broadcast %10 : vector<1x128xf32> to vector<8x128xf32>
    %12 = arith.addf %9, %11 : vector<8x128xf32>
    %c0_11 = arith.constant 0 : index
    %c0_12 = arith.constant 0 : index
    %13 = vector.load %arg6[%c0_11, %c0_12] : memref<8x128xf32, #tpu.memory_space<vmem>>, vector<8x128xf32>
    tpu.vector_store %arg6[%c0_11, %c0_12], %12 {strides = array<i32>} : memref<8x128xf32, #tpu.memory_space<vmem>>, vector<8x128xf32>,
    return
  }
  func.func @transform_0(%arg0: i32) -> (i32, i32) {
    %c0_i32 = arith.constant 0 : i32
    %c0_i32_0 = arith.constant 0 : i32
    return %arg0, %c0_i32 : i32, i32
  }
  func.func @transform_1(%arg0: i32) -> (i32, i32) {
    %c0_i32 = arith.constant 0 : i32
    %c0_i32_0 = arith.constant 0 : i32
    %c0_i32_1 = arith.constant 0 : i32
    return %c0_i32, %c0_i32_0 : i32, i32
  }
  func.func @transform_2(%arg0: i32) -> (i32, i32) {
    %c0_i32 = arith.constant 0 : i32
    %c0_i32_0 = arith.constant 0 : i32
    %c0_i32_1 = arith.constant 0 : i32
    return %c0_i32, %c0_i32_0 : i32, i32
  }
  func.func @transform_3(%arg0: i32) -> (i32, i32) {
    %c0_i32 = arith.constant 0 : i32
    %c0_i32_0 = arith.constant 0 : i32
    %c0_i32_1 = arith.constant 0 : i32
    return %c0_i32, %c0_i32_0 : i32, i32
  }
  func.func @transform_4(%arg0: i32) -> (i32, i32) {
    %c0_i32 = arith.constant 0 : i32
    %c0_i32_0 = arith.constant 0 : i32
    %c0_i32_1 = arith.constant 0 : i32
    return %c0_i32, %c0_i32_0 : i32, i32
  }
  func.func @transform_5(%arg0: i32) -> (i32, i32) {
    %c0_i32 = arith.constant 0 : i32
    %c0_i32_0 = arith.constant 0 : i32
    return %arg0, %c0_i32 : i32, i32
  }
}

</mosaic_0001>

<bundles_post_ra>
// kernel: tpu_custom_call.1
= control target key start
LH: loop header
LB: loop body
LE: loop exit
PB: predicated region body
PF: predicated region fallthrough
CT: control target
= control target key end

     0   :  { %10 = vsyncpa [#allocation3], 0  ;;  %s324_s0 = inlined_call_operand.hbm [shape: f32[8,32], index: 0, kind: input, shape index: {}]   ;;  %s325_s1 = inlined_call_operand.hbm [shape: f32[32,128], index: 1, kind: input, shape index: {}]   ;;  %s326_s2 = inlined_call_operand.vmem [shape: f32[1,128], index: 2, kind: input, shape index: {}]   ;;  %s327_s3 = inlined_call_operand.hbm [shape: f32[128,128], index: 3, kind: input, shape index: {}]   ;;  %s328_s4 = inlined_call_operand.vmem [shape: f32[1,128], index: 4, kind: input, shape index: {}]   ;;  %s329_s5 = inlined_call_operand.hbm [shape: f32[8,128], index: 5, kind: output, shape index: {}]  }
   0x1   :  { %11 = vsyncpa [#allocation6], 0  ;;  %s28_s20 = sshll.u32 %s325_s1, 4  ;;  %s29_s20 = int_to_ptr.hbm [resolvable:$true] %s28_s20 }
   0x2   :  { %12 = vsyncpa [#allocation4], 0  ;;  %s270_s21 = smov [#allocation5]   ;;  %s18_s25 = sshll.u32 %s324_s0, 4  ;;  %s19_s25 = int_to_ptr.hbm [resolvable:$true] %s18_s25 }
   0x3   :  { %s30_s22 = sshll.u32 %s270_s21, 4  ;;  %s271_s26 = smov 128   ;;  %s31_s22 = int_to_ptr.vmem [resolvable:$true] %s30_s22 }
   0x4   :  { %s272_s27 = smov 8   ;;  %s273_s28 = smov [#allocation2]  }
   0x5   :  { %36 = dma.hbm_to_vmem [thread:$0]  %s29_s20, 512, %s31_s22, [#allocation6], %s271_s26, %s271_s26, %s272_s27  }
   0x6   :  { %s20_s29 = sshll.u32 %s273_s28, 4  ;;  %s43_s7 = sshll.u32 %s327_s3, 4  ;;  %s21_s29 = int_to_ptr.vmem [resolvable:$true] %s20_s29  ;;  %s44_s7 = int_to_ptr.hbm [resolvable:$true] %s43_s7 }
   0x7   :  { %23 = dma.hbm_to_vmem [thread:$0]  %s19_s25, 128, %s21_s29, [#allocation3]  }
   0x8   :  { %s274_s1 = smov [#allocation7]  }
   0x9   :  { %s45_s8 = sshll.u32 %s274_s1, 4  ;;  %s46_s8 = int_to_ptr.vmem [resolvable:$true] %s45_s8 }
   0xa   :  { %51 = dma.hbm_to_vmem [thread:$0]  %s44_s7, 2048, %s46_s8, [#allocation6], %s271_s26, %s271_s26, %s272_s27  }
   0xb   :  { %264 = dma.done.wait [#allocation3], 128  }
   0xc   :  { %265 = vsyncadd [#allocation3], 4294967168 }
   0xd   :  { %266 = dma.done.wait [#allocation6], 2560  }
   0xe   :  { %267 = vsyncadd [#allocation6], 4294964736  ;;  %v70_v0 = vld [vmem:[#allocation5 + $0x18] sm:$0xff]  ;;  %v69_v1 = vld [vmem:[#allocation5 + $0x10] sm:$0xff]  ;;  %vm75_vm0 = vcmask 261120   ;;  %s275_s11 = smov [#allocation8]  }
   0xf   :  { %91 = vmatpush.msra.mxu0 %v70_v0  ;;  %v115_v2 = vld [vmem:[#allocation7 + $0x78] sm:$0xff]  ;;  %v68_v3 = vld [vmem:[#allocation5 + $0x8] sm:$0xff]  ;;  %v114_v4 = vld [vmem:[#allocation7 + $0x70] sm:$0xff]  ;;  %s146_s12 = sshll.u32 %s275_s11, 4  ;;  %s148_s15 = sshll.u32 %s329_s5, 4  ;;  %s147_s12 = int_to_ptr.vmem [resolvable:$true] %s146_s12  ;;  %s149_s15 = int_to_ptr.hbm [resolvable:$true] %s148_s15 }
  0x10   :  { %120 = vmatpush.msra.mxu1 %v115_v2  ;;  %v113_v5 = vld [vmem:[#allocation7 + $0x68] sm:$0xff]  ;;  %v67_v6 = vld [vmem:[#allocation5] sm:$0xff]  ;;  %v66_v7 = vld [vmem:[#allocation2] sm:$0xff] }
  0x11   :  { %92 = vmatpush.msra.mxu0 %v69_v1  ;;  %v112_v8 = vld [vmem:[#allocation7 + $0x60] sm:$0xff]  ;;  %v111_v9 = vld [vmem:[#allocation7 + $0x58] sm:$0xff]  ;;  %v110_v10 = vld [vmem:[#allocation7 + $0x50] sm:$0xff] }
  0x12   :  { %121 = vmatpush.msra.mxu1 %v114_v4  ;;  %v109_v11 = vld [vmem:[#allocation7 + $0x48] sm:$0xff]  ;;  %v108_v12 = vld [vmem:[#allocation7 + $0x40] sm:$0xff]  ;;  %v107_v13 = vld [vmem:[#allocation7 + $0x38] sm:$0xff] }
  0x13   :  { %93 = vmatpush.msra.mxu0 %v68_v3  ;;  %v106_v14 = vld [vmem:[#allocation7 + $0x30] sm:$0xff]  ;;  %v105_v15 = vld [vmem:[#allocation7 + $0x28] sm:$0xff]  ;;  %v104_v16 = vld [vmem:[#allocation7 + $0x20] sm:$0xff] }
  0x14   :  { %122 = vmatpush.msra.mxu1 %v113_v5  ;;  %v103_v17 = vld [vmem:[#allocation7 + $0x18] sm:$0xff]  ;;  %v102_v18 = vld [vmem:[#allocation7 + $0x10] sm:$0xff]  ;;  %v101_v19 = vld [vmem:[#allocation7 + $0x8] sm:$0xff] }
  0x15   :  { %94 = vmatpush.msra.mxu0 %v67_v6  ;;  %v100_v20 = vld [vmem:[#allocation7] sm:$0xff]  ;;  %v166_v21 = vld [vmem:[%s326_s2] ss:$0 sm:$0xff] }
  0x16   :  { %159 = vmatmul.msk.f32.vlgmr.msra.gmra.mxu0 %vm75_vm0, %v66_v7  ;;  %123 = vmatpush.msra.mxu1 %v112_v8  ;;  %v167_v25 = vld [vmem:[%s328_s4] ss:$0 sm:$0xff] }
  0x18   :  { %124 = vmatpush.msra.mxu1 %v111_v9 }
  0x1a   :  { %125 = vmatpush.msra.mxu1 %v110_v10 }
  0x1c   :  { %126 = vmatpush.msra.mxu1 %v109_v11 }
  0x1e   :  { %127 = vmatpush.msra.mxu1 %v108_v12 }
  0x20   :  { %128 = vmatpush.msra.mxu1 %v107_v13 }
  0x22   :  { %129 = vmatpush.msra.mxu1 %v106_v14 }
  0x24   :  { %130 = vmatpush.msra.mxu1 %v105_v15 }
  0x26   :  { %131 = vmatpush.msra.mxu1 %v104_v16 }
  0x28   :  { %132 = vmatpush.msra.mxu1 %v103_v17 }
  0x2a   :  { %133 = vmatpush.msra.mxu1 %v102_v18 }
  0x2c   :  { %134 = vmatpush.msra.mxu1 %v101_v19 }
  0x2e   :  { %135 = vmatpush.msra.mxu1 %v100_v20 }
  0x93   :  { %v96_v22 = vpop.f32.mrf.mxu0 }
  0x94   :  { %v97_v23 = vadd.f32 %v166_v21, %v96_v22 }
  0x96   :  { %v99_v24 = vmax.f32 %v97_v23, 0.0 }
  0x98   :  { %136 = vmatmul.f32.vlgmr.msra.gmra.mxu1 %v99_v24 }
 0x115   :  { %v137_v26 = vpop.f32.mrf.mxu1 }
 0x116   :  { %v138_v27 = vadd.f32 %v167_v25, %v137_v26 }
 0x118   :  { %140 = vst [vmem:[#allocation8] sm:$0xff] %v138_v27 }
 0x119   :  { %151 = dma.vmem_to_hbm [thread:$0]  %s147_s12, 128, %s149_s15, [#allocation4]  }
 0x11a   :  { %268 = dma.done.wait [#allocation4], 128  }
 0x11b   :  { %269 = vsyncadd [#allocation4], 4294967168 }
 0x11c   :  { %156 = vsyncpa [#allocation3], 1 }
 0x11d   :  { %157 = vsyncpa [#allocation6], 1 }
 0x11e   :  { %158 = vsyncpa [#allocation4], 1 }

</bundles_post_ra>
